<compile_context>
chip_gen: v7x
topology: tpu7x:2x2x1
jax: 0.10.0
libtpu: 0.0.40
codegen_flags: <defaults>
</compile_context>

<pallas_src>
import jax
import jax.numpy as jnp
from jax.experimental import pallas as pl
from jax.experimental.pallas import tpu as pltpu


# ---------------------------------------------------------------------------
# Kernels
# ---------------------------------------------------------------------------

def _resblock_id_kernel(x_ref, w1_ref, b1_ref, w2_ref, b2_ref, o_ref):
    """in_dim == out_dim: shortcut is identity, so just add x (no extra matmul)."""
    x = x_ref[...]                                   # f32 (tb, d)
    xb = x.astype(jnp.bfloat16)                      # bf16 operand for the MXU
    h = jnp.dot(xb, w1_ref[...], preferred_element_type=jnp.float32) + b1_ref[...]
    h = jnp.maximum(h, 0.0).astype(jnp.bfloat16)
    out = jnp.dot(h, w2_ref[...], preferred_element_type=jnp.float32) + b2_ref[...]
    o_ref[...] = jnp.maximum(out + x, 0.0).astype(o_ref.dtype)


def _resblock_proj_kernel(x_ref, wf_ref, bf_ref, w2_ref, b2_ref, o_ref):
    """in_dim != out_dim: W1 and Ws fused along the output axis -> one x-matmul."""
    xb = x_ref[...].astype(jnp.bfloat16)
    out_p = o_ref.shape[-1]                          # static, multiple of 128
    # hz[:, :out_p] = x @ W1 + b1 (pre-activation of lin1); hz[:, out_p:] = x @ Ws + bs.
    # NOTE: hz is (tb, 2*out_p) f32 and stays live across the second matmul; tb is
    # sized in the wrapper so this slab fits the VMEM budget.
    hz = jnp.dot(xb, wf_ref[...], preferred_element_type=jnp.float32) + bf_ref[...]
    h = jnp.maximum(hz[:, :out_p], 0.0).astype(jnp.bfloat16)
    identity = hz[:, out_p:]
    out = jnp.dot(h, w2_ref[...], preferred_element_type=jnp.float32) + b2_ref[...]
    o_ref[...] = jnp.maximum(out + identity, 0.0).astype(o_ref.dtype)


# ---------------------------------------------------------------------------
# Packing helpers (one-time, outside the hot path)
# ---------------------------------------------------------------------------

def _round_up(n, m):
    return ((n + m - 1) // m) * m


def _pad2(a, rows, cols, dtype):
    a = jnp.asarray(a, dtype)
    return jnp.pad(a, ((0, rows - a.shape[0]), (0, cols - a.shape[1])))


def _pad_bias(b, cols):
    b = jnp.asarray(b, jnp.float32).reshape(1, -1)
    return jnp.pad(b, ((0, 0), (0, cols - b.shape[1])))


def pack_params(w1, b1, w2, b2, ws=None, bs=None):
    """One-time weight packing: pad to 128-lane multiples, fuse W1||Ws, cast to bf16."""
    in_dim, out_dim = w1.shape
    in_p = _round_up(in_dim, 128)
    out_p = _round_up(out_dim, 128)
    has_proj = ws is not None
    if not has_proj:
        assert in_dim == out_dim, "identity shortcut requires in_dim == out_dim"

    w2_p = _pad2(w2, out_p, out_p, jnp.bfloat16)
    b2_p = _pad_bias(b2, out_p)
    if has_proj:
        wf = jnp.concatenate([_pad2(w1, in_p, out_p, jnp.bfloat16),
                              _pad2(ws, in_p, out_p, jnp.bfloat16)], axis=1)
        bf = jnp.concatenate([_pad_bias(b1, out_p), _pad_bias(bs, out_p)], axis=1)
    else:
        wf = _pad2(w1, in_p, out_p, jnp.bfloat16)
        bf = _pad_bias(b1, out_p)

    return dict(wf=wf, bf=bf, w2=w2_p, b2=b2_p,
                in_dim=in_dim, out_dim=out_dim, in_p=in_p, out_p=out_p,
                has_proj=has_proj)


# ---------------------------------------------------------------------------
# VMEM-aware sizing
# ---------------------------------------------------------------------------

def _vmem_limit_bytes():
    """~80% of physical VMEM (v5e/v6e: ~102 MiB, v7x: ~51 MiB)."""
    try:
        cap = int(pltpu.get_tpu_info().vmem_capacity_bytes)
    except Exception:
        cap = 64 << 20  # conservative: assume the smallest (v7x) VMEM
    return int(cap * 0.8)


def _pick_tile_b(batch, in_p, out_p, has_proj, vmem_limit, tile_b):
    """Pick the batch tile so streamed buffers + temporaries + weights fit VMEM."""
    b8 = _round_up(batch, 8)
    n1 = 2 * out_p if has_proj else out_p
    # Resident bf16 weights (single-buffered) + f32 biases.
    resident = 2 * (in_p * n1 + out_p * out_p) + 4 * (n1 + out_p)
    # Per batch-row: double-buffered f32 x/out streams + f32/bf16 in-kernel temporaries.
    per_row = 4 * (2 * in_p + 2 * out_p + n1 + out_p) + 2 * (in_p + out_p)
    # 2x resident: stays safe even if the Buffered(1) specs fall back to double buffering.
    budget = vmem_limit - 2 * resident - (4 << 20)
    cap = (budget // per_row) // 8 * 8 if budget > 8 * per_row else 8
    return max(8, min(tile_b, b8, cap))


# ---------------------------------------------------------------------------
# Wrapper
# ---------------------------------------------------------------------------

def residual_block(x, params, *, tile_b=512):
    """ResidualBlock forward.  x: (B, in_dim) f32, params: output of pack_params."""
    in_dim, out_dim = params["in_dim"], params["out_dim"]
    in_p, out_p = params["in_p"], params["out_p"]
    has_proj = params["has_proj"]
    B = x.shape[0]
    assert x.shape[1] == in_dim

    vmem_limit = _vmem_limit_bytes()
    tb = _pick_tile_b(B, in_p, out_p, has_proj, vmem_limit, tile_b)
    b8 = _round_up(B, 8)                       # only sublane-align; no full-tile padding
    grid = (pl.cdiv(b8, tb),)                  # ragged last tile is masked by Pallas

    x_p = _pad2(x, b8, in_p, jnp.float32)

    kernel = _resblock_proj_kernel if has_proj else _resblock_id_kernel
    n1 = 2 * out_p if has_proj else out_p

    x_spec = pl.BlockSpec((tb, in_p), lambda i: (i, 0))
    o_spec = pl.BlockSpec((tb, out_p), lambda i: (i, 0))

    compiler_params = pltpu.CompilerParams(
        dimension_semantics=("parallel",),     # megacore / dual-TC sharding of batch tiles
        vmem_limit_bytes=vmem_limit,
    )

    def build(single_buffer_weights):
        if single_buffer_weights:
            # Constant-index weights never need a second pipeline buffer.
            resident = lambda shape: pl.BlockSpec(shape, lambda i: (0, 0),
                                                  pipeline_mode=pl.Buffered(1))
        else:
            resident = lambda shape: pl.BlockSpec(shape, lambda i: (0, 0))
        return pl.pallas_call(
            kernel,
            out_shape=jax.ShapeDtypeStruct((b8, out_p), jnp.float32),
            grid=grid,
            in_specs=[x_spec,
                      resident((in_p, n1)),
                      resident((1, n1)),
                      resident((out_p, out_p)),
                      resident((1, out_p))],
            out_specs=o_spec,
            compiler_params=compiler_params,
        )

    operands = (x_p, params["wf"], params["bf"], params["w2"], params["b2"])
    try:
        out = build(True)(*operands)
        out.block_until_ready()
    except Exception:
        # Fallback if single-buffered (Buffered(1)) specs are unsupported on this JAX.
        out = build(False)(*operands)

    return out[:B, :out_dim]


# ---------------------------------------------------------------------------
# Reference + parameter construction
# ---------------------------------------------------------------------------

def make_params(key, in_dim, out_dim):
    """Deterministic synthetic parameters (PyTorch nn.Linear-style init ranges)."""
    k1, k2, k3, k4, k5, k6 = jax.random.split(key, 6)
    s1 = 1.0 / jnp.sqrt(in_dim)
    s2 = 1.0 / jnp.sqrt(out_dim)
    w1 = jax.random.uniform(k1, (in_dim, out_dim), jnp.float32, -s1, s1)
    b1 = jax.random.uniform(k2, (out_dim,), jnp.float32, -s1, s1)
    w2 = jax.random.uniform(k3, (out_dim, out_dim), jnp.float32, -s2, s2)
    b2 = jax.random.uniform(k4, (out_dim,), jnp.float32, -s2, s2)
    if in_dim != out_dim:
        ws = jax.random.uniform(k5, (in_dim, out_dim), jnp.float32, -s1, s1)
        bs = jax.random.uniform(k6, (out_dim,), jnp.float32, -s1, s1)
    else:
        ws, bs = None, None
    return w1, b1, w2, b2, ws, bs


def residual_block_ref(x, w1, b1, w2, b2, ws=None, bs=None):
    identity = x if ws is None else x @ ws + bs
    h = jnp.maximum(x @ w1 + b1, 0.0)
    out = h @ w2 + b2
    return jnp.maximum(out + identity, 0.0)


if __name__ == "__main__":
    key = jax.random.PRNGKey(0)
    kx1, kp1, kx2, kp2 = jax.random.split(key, 4)

    # Case 1: projection shortcut (in_dim != out_dim)
    B, in_dim, out_dim = 8, 32, 64
    x1 = jax.random.normal(kx1, (B, in_dim), jnp.float32)
    raw1 = make_params(kp1, in_dim, out_dim)
    packed1 = pack_params(*raw1)                      # one-time packing, outside hot path
    out1 = jax.block_until_ready(residual_block(x1, packed1))
    ref1 = residual_block_ref(x1, *raw1)
    assert out1.shape == (B, out_dim)
    # bf16 MXU operands -> relaxed tolerance vs the f32 reference.
    assert jnp.allclose(out1, ref1, atol=5e-2, rtol=5e-2), \
        float(jnp.max(jnp.abs(out1 - ref1)))

    # Case 2: identity shortcut (in_dim == out_dim) — no shortcut matmul at all
    B2, dim = 8, 64
    x2 = jax.random.normal(kx2, (B2, dim), jnp.float32)
    raw2 = make_params(kp2, dim, dim)
    packed2 = pack_params(*raw2)
    out2 = jax.block_until_ready(residual_block(x2, packed2))
    ref2 = residual_block_ref(x2, *raw2)
    assert out2.shape == (B2, dim)
    assert jnp.allclose(out2, ref2, atol=5e-2, rtol=5e-2), \
        float(jnp.max(jnp.abs(out2 - ref2)))

    print("KERNEL_OK")
</pallas_src>

<mosaic_0001>
module attributes {stable_mosaic.version = 11 : i64} {
  func.func @_resblock_proj_kernel(%arg0: i32, %arg1: memref<8x128xf32, #tpu.memory_space<vmem>>, %arg2: memref<128x256xbf16, #tpu.memory_space<vmem>>, %arg3: memref<1x256xf32, #tpu.memory_space<vmem>>, %arg4: memref<128x128xbf16, #tpu.memory_space<vmem>>, %arg5: memref<1x128xf32, #tpu.memory_space<vmem>>, %arg6: memref<8x128xf32, #tpu.memory_space<vmem>>) attributes {dimension_semantics = [#tpu.dimension_semantics<parallel>], iteration_bounds = array<i64: 1>, scalar_prefetch = 0 : i64, scratch_operands = 0 : i64, tpu.core_type = #tpu.core_type<tc>, window_params = [{transform_indices = @transform_0, window_bounds = array<i64: 8, 128>}, {pipeline_mode = #tpu.pipeline_mode<synchronous>, transform_indices = @transform_1, window_bounds = array<i64: 128, 256>}, {pipeline_mode = #tpu.pipeline_mode<synchronous>, transform_indices = @transform_2, window_bounds = array<i64: 1, 256>}, {pipeline_mode = #tpu.pipeline_mode<synchronous>, transform_indices = @transform_3, window_bounds = array<i64: 128, 128>}, {pipeline_mode = #tpu.pipeline_mode<synchronous>, transform_indices = @transform_4, window_bounds = array<i64: 1, 128>}, {transform_indices = @transform_5, window_bounds = array<i64: 8, 128>}]} {
    %c0 = arith.constant 0 : index
    %c0_0 = arith.constant 0 : index
    %0 = vector.load %arg1[%c0, %c0_0] : memref<8x128xf32, #tpu.memory_space<vmem>>, vector<8x128xf32>
    %1 = arith.truncf %0 : vector<8x128xf32> to vector<8x128xbf16>
    %c0_1 = arith.constant 0 : index
    %c0_2 = arith.constant 0 : index
    %2 = vector.load %arg2[%c0_1, %c0_2] : memref<128x256xbf16, #tpu.memory_space<vmem>>, vector<128x256xbf16>
    %cst = arith.constant dense<0.000000e+00> : vector<8x256xf32>
    %3 = tpu.matmul %1, %2, %cst {dimension_numbers = #tpu.dot_dimension_numbers<[1], [0], [0], [1], [0, 0, 1, 1], [], []>} : vector<8x128xbf16>, vector<128x256xbf16>, vector<8x256xf32> -> vector<8x256xf32>
    %c0_3 = arith.constant 0 : index
    %c0_4 = arith.constant 0 : index
    %4 = vector.load %arg3[%c0_3, %c0_4] : memref<1x256xf32, #tpu.memory_space<vmem>>, vector<1x256xf32>
    %5 = vector.broadcast %4 : vector<1x256xf32> to vector<8x256xf32>
    %6 = arith.addf %3, %5 : vector<8x256xf32>
    %7 = vector.extract_strided_slice %6 {offsets = [0, 0], sizes = [8, 128], strides = [1, 1]} : vector<8x256xf32> to vector<8x128xf32>
    %cst_5 = arith.constant 0.000000e+00 : f32
    %8 = vector.broadcast %cst_5 : f32 to vector<8x128xf32>
    %9 = arith.maximumf %7, %8 : vector<8x128xf32>
    %10 = arith.truncf %9 : vector<8x128xf32> to vector<8x128xbf16>
    %11 = vector.extract_strided_slice %6 {offsets = [0, 128], sizes = [8, 128], strides = [1, 1]} : vector<8x256xf32> to vector<8x128xf32>
    %c0_6 = arith.constant 0 : index
    %c0_7 = arith.constant 0 : index
    %12 = vector.load %arg4[%c0_6, %c0_7] : memref<128x128xbf16, #tpu.memory_space<vmem>>, vector<128x128xbf16>
    %cst_8 = arith.constant dense<0.000000e+00> : vector<8x128xf32>
    %13 = tpu.matmul %10, %12, %cst_8 {dimension_numbers = #tpu.dot_dimension_numbers<[1], [0], [0], [1], [0, 0, 1, 1], [], []>} : vector<8x128xbf16>, vector<128x128xbf16>, vector<8x128xf32> -> vector<8x128xf32>
    %c0_9 = arith.constant 0 : index
    %c0_10 = arith.constant 0 : index
    %14 = vector.load %arg5[%c0_9, %c0_10] : memref<1x128xf32, #tpu.memory_space<vmem>>, vector<1x128xf32>
    %15 = vector.broadcast %14 : vector<1x128xf32> to vector<8x128xf32>
    %16 = arith.addf %13, %15 : vector<8x128xf32>
    %17 = arith.addf %16, %11 : vector<8x128xf32>
    %cst_11 = arith.constant 0.000000e+00 : f32
    %18 = vector.broadcast %cst_11 : f32 to vector<8x128xf32>
    %19 = arith.maximumf %17, %18 : vector<8x128xf32>
    %c0_12 = arith.constant 0 : index
    %c0_13 = arith.constant 0 : index
    %20 = vector.load %arg6[%c0_12, %c0_13] : memref<8x128xf32, #tpu.memory_space<vmem>>, vector<8x128xf32>
    tpu.vector_store %arg6[%c0_12, %c0_13], %19 {strides = array<i32>} : memref<8x128xf32, #tpu.memory_space<vmem>>, vector<8x128xf32>,
    return
  }
  func.func @transform_0(%arg0: i32) -> (i32, i32) {
    %c0_i32 = arith.constant 0 : i32
    %c0_i32_0 = arith.constant 0 : i32
    return %arg0, %c0_i32 : i32, i32
  }
  func.func @transform_1(%arg0: i32) -> (i32, i32) {
    %c0_i32 = arith.constant 0 : i32
    %c0_i32_0 = arith.constant 0 : i32
    %c0_i32_1 = arith.constant 0 : i32
    return %c0_i32, %c0_i32_0 : i32, i32
  }
  func.func @transform_2(%arg0: i32) -> (i32, i32) {
    %c0_i32 = arith.constant 0 : i32
    %c0_i32_0 = arith.constant 0 : i32
    %c0_i32_1 = arith.constant 0 : i32
    return %c0_i32, %c0_i32_0 : i32, i32
  }
  func.func @transform_3(%arg0: i32) -> (i32, i32) {
    %c0_i32 = arith.constant 0 : i32
    %c0_i32_0 = arith.constant 0 : i32
    %c0_i32_1 = arith.constant 0 : i32
    return %c0_i32, %c0_i32_0 : i32, i32
  }
  func.func @transform_4(%arg0: i32) -> (i32, i32) {
    %c0_i32 = arith.constant 0 : i32
    %c0_i32_0 = arith.constant 0 : i32
    %c0_i32_1 = arith.constant 0 : i32
    return %c0_i32, %c0_i32_0 : i32, i32
  }
  func.func @transform_5(%arg0: i32) -> (i32, i32) {
    %c0_i32 = arith.constant 0 : i32
    %c0_i32_0 = arith.constant 0 : i32
    return %arg0, %c0_i32 : i32, i32
  }
}

module attributes {stable_mosaic.version = 11 : i64} {
  func.func @_resblock_proj_kernel(%arg0: i32, %arg1: memref<8x128xf32, #tpu.memory_space<vmem>>, %arg2: memref<128x256xbf16, #tpu.memory_space<vmem>>, %arg3: memref<1x256xf32, #tpu.memory_space<vmem>>, %arg4: memref<128x128xbf16, #tpu.memory_space<vmem>>, %arg5: memref<1x128xf32, #tpu.memory_space<vmem>>, %arg6: memref<8x128xf32, #tpu.memory_space<vmem>>) attributes {dimension_semantics = [#tpu.dimension_semantics<parallel>], iteration_bounds = array<i64: 1>, scalar_prefetch = 0 : i64, scratch_operands = 0 : i64, tpu.core_type = #tpu.core_type<tc>, window_params = [{transform_indices = @transform_0, window_bounds = array<i64: 8, 128>}, {pipeline_mode = #tpu.pipeline_mode<synchronous>, transform_indices = @transform_1, window_bounds = array<i64: 128, 256>}, {pipeline_mode = #tpu.pipeline_mode<synchronous>, transform_indices = @transform_2, window_bounds = array<i64: 1, 256>}, {pipeline_mode = #tpu.pipeline_mode<synchronous>, transform_indices = @transform_3, window_bounds = array<i64: 128, 128>}, {pipeline_mode = #tpu.pipeline_mode<synchronous>, transform_indices = @transform_4, window_bounds = array<i64: 1, 128>}, {transform_indices = @transform_5, window_bounds = array<i64: 8, 128>}]} {
    %c0 = arith.constant 0 : index
    %c0_0 = arith.constant 0 : index
    %0 = vector.load %arg1[%c0, %c0_0] : memref<8x128xf32, #tpu.memory_space<vmem>>, vector<8x128xf32>
    %1 = arith.truncf %0 : vector<8x128xf32> to vector<8x128xbf16>
    %c0_1 = arith.constant 0 : index
    %c0_2 = arith.constant 0 : index
    %2 = vector.load %arg2[%c0_1, %c0_2] : memref<128x256xbf16, #tpu.memory_space<vmem>>, vector<128x256xbf16>
    %cst = arith.constant dense<0.000000e+00> : vector<8x256xf32>
    %3 = tpu.matmul %1, %2, %cst {dimension_numbers = #tpu.dot_dimension_numbers<[1], [0], [0], [1], [0, 0, 1, 1], [], []>} : vector<8x128xbf16>, vector<128x256xbf16>, vector<8x256xf32> -> vector<8x256xf32>
    %c0_3 = arith.constant 0 : index
    %c0_4 = arith.constant 0 : index
    %4 = vector.load %arg3[%c0_3, %c0_4] : memref<1x256xf32, #tpu.memory_space<vmem>>, vector<1x256xf32>
    %5 = vector.broadcast %4 : vector<1x256xf32> to vector<8x256xf32>
    %6 = arith.addf %3, %5 : vector<8x256xf32>
    %7 = vector.extract_strided_slice %6 {offsets = [0, 0], sizes = [8, 128], strides = [1, 1]} : vector<8x256xf32> to vector<8x128xf32>
    %cst_5 = arith.constant 0.000000e+00 : f32
    %8 = vector.broadcast %cst_5 : f32 to vector<8x128xf32>
    %9 = arith.maximumf %7, %8 : vector<8x128xf32>
    %10 = arith.truncf %9 : vector<8x128xf32> to vector<8x128xbf16>
    %11 = vector.extract_strided_slice %6 {offsets = [0, 128], sizes = [8, 128], strides = [1, 1]} : vector<8x256xf32> to vector<8x128xf32>
    %c0_6 = arith.constant 0 : index
    %c0_7 = arith.constant 0 : index
    %12 = vector.load %arg4[%c0_6, %c0_7] : memref<128x128xbf16, #tpu.memory_space<vmem>>, vector<128x128xbf16>
    %cst_8 = arith.constant dense<0.000000e+00> : vector<8x128xf32>
    %13 = tpu.matmul %10, %12, %cst_8 {dimension_numbers = #tpu.dot_dimension_numbers<[1], [0], [0], [1], [0, 0, 1, 1], [], []>} : vector<8x128xbf16>, vector<128x128xbf16>, vector<8x128xf32> -> vector<8x128xf32>
    %c0_9 = arith.constant 0 : index
    %c0_10 = arith.constant 0 : index
    %14 = vector.load %arg5[%c0_9, %c0_10] : memref<1x128xf32, #tpu.memory_space<vmem>>, vector<1x128xf32>
    %15 = vector.broadcast %14 : vector<1x128xf32> to vector<8x128xf32>
    %16 = arith.addf %13, %15 : vector<8x128xf32>
    %17 = arith.addf %16, %11 : vector<8x128xf32>
    %cst_11 = arith.constant 0.000000e+00 : f32
    %18 = vector.broadcast %cst_11 : f32 to vector<8x128xf32>
    %19 = arith.maximumf %17, %18 : vector<8x128xf32>
    %c0_12 = arith.constant 0 : index
    %c0_13 = arith.constant 0 : index
    %20 = vector.load %arg6[%c0_12, %c0_13] : memref<8x128xf32, #tpu.memory_space<vmem>>, vector<8x128xf32>
    tpu.vector_store %arg6[%c0_12, %c0_13], %19 {strides = array<i32>} : memref<8x128xf32, #tpu.memory_space<vmem>>, vector<8x128xf32>,
    return
  }
  func.func @transform_0(%arg0: i32) -> (i32, i32) {
    %c0_i32 = arith.constant 0 : i32
    %c0_i32_0 = arith.constant 0 : i32
    return %arg0, %c0_i32 : i32, i32
  }
  func.func @transform_1(%arg0: i32) -> (i32, i32) {
    %c0_i32 = arith.constant 0 : i32
    %c0_i32_0 = arith.constant 0 : i32
    %c0_i32_1 = arith.constant 0 : i32
    return %c0_i32, %c0_i32_0 : i32, i32
  }
  func.func @transform_2(%arg0: i32) -> (i32, i32) {
    %c0_i32 = arith.constant 0 : i32
    %c0_i32_0 = arith.constant 0 : i32
    %c0_i32_1 = arith.constant 0 : i32
    return %c0_i32, %c0_i32_0 : i32, i32
  }
  func.func @transform_3(%arg0: i32) -> (i32, i32) {
    %c0_i32 = arith.constant 0 : i32
    %c0_i32_0 = arith.constant 0 : i32
    %c0_i32_1 = arith.constant 0 : i32
    return %c0_i32, %c0_i32_0 : i32, i32
  }
  func.func @transform_4(%arg0: i32) -> (i32, i32) {
    %c0_i32 = arith.constant 0 : i32
    %c0_i32_0 = arith.constant 0 : i32
    %c0_i32_1 = arith.constant 0 : i32
    return %c0_i32, %c0_i32_0 : i32, i32
  }
  func.func @transform_5(%arg0: i32) -> (i32, i32) {
    %c0_i32 = arith.constant 0 : i32
    %c0_i32_0 = arith.constant 0 : i32
    return %arg0, %c0_i32 : i32, i32
  }
}

</mosaic_0001>

<bundles_post_ra>
// kernel: tpu_custom_call.1
= control target key start
LH: loop header
LB: loop body
LE: loop exit
PB: predicated region body
PF: predicated region fallthrough
CT: control target
= control target key end

     0   :  { %10 = vsyncpa [#allocation3], 0  ;;  %s630_s0 = inlined_call_operand.hbm [shape: f32[8,128], index: 0, kind: input, shape index: {}]   ;;  %s631_s1 = inlined_call_operand.hbm [shape: bf16[128,256], index: 1, kind: input, shape index: {}]   ;;  %s632_s2 = inlined_call_operand.vmem [shape: f32[1,256], index: 2, kind: input, shape index: {}]   ;;  %s633_s3 = inlined_call_operand.hbm [shape: bf16[128,128], index: 3, kind: input, shape index: {}]   ;;  %s634_s4 = inlined_call_operand.vmem [shape: f32[1,128], index: 4, kind: input, shape index: {}]   ;;  %s635_s5 = inlined_call_operand.hbm [shape: f32[8,128], index: 5, kind: output, shape index: {}]  }
   0x1   :  { %11 = vsyncpa [#allocation6], 0 }
   0x2   :  { %12 = vsyncpa [#allocation4], 0  ;;  %s535_s18 = smov [#allocation5]   ;;  %s441_s22 = scalar_lea.hbm %s631_s1, 2048 }
   0x3   :  { %s28_s19 = sshll.u32 %s535_s18, 4  ;;  %p442_p0 = scmp.ne.s32.totalorder %s631_s1, %s441_s22  ;;  %s29_s19 = int_to_ptr.vmem [resolvable:$true] %s28_s19 }
   0x4   :  { %p445_p1 = scmp.lt.u32.totalorder %s441_s22, %s631_s1 }
   0x6   :  { %p447_p2 = pnand %p445_p1, %p442_p0 }
   0x8   :  { %450 = shalt.err (!%p447_p2)
}
   0x9   :  { %s451_s27 = scalar_lea.vmem %s29_s19, 2048  ;;  %p456_p4 = scmp.lt.s32.totalorder %s29_s19, %s29_s19 }
   0xa   :  { %p452_p3 = scmp.ne.s32.totalorder %s29_s19, %s451_s27  ;;  %p457_p5 = scmp.lt.s32.totalorder %s451_s27, %s451_s27 }
   0xc   :  { %p458_p6 = por %p457_p5, %p456_p4 }
   0xe   :  { %p459_p7 = pnand %p458_p6, %p452_p3 }
  0x10   :  { %462 = shalt.err (!%p459_p7)
}
  0x11   :  { %s536_s28 = smov 128   ;;  %s537_s29 = smov 8  }
  0x12   :  { %34 = dma.hbm_to_vmem [thread:$0]  %s631_s1, 2048, %s29_s19, [#allocation6], %s536_s28, %s536_s28, %s537_s29  }
  0x13   :  { %s538_s7 = smov [#allocation2]   ;;  %s539_s9 = smov [#allocation7]  }
  0x14   :  { %s19_s8 = sshll.u32 %s538_s7, 4  ;;  %s42_s10 = sshll.u32 %s539_s9, 4  ;;  %s20_s8 = int_to_ptr.vmem [resolvable:$true] %s19_s8  ;;  %s43_s10 = int_to_ptr.vmem [resolvable:$true] %s42_s10 }
  0x15   :  { %s463_s13 = scalar_lea.hbm %s630_s0, 128 }
  0x16   :  { %p464_p8 = scmp.ne.s32.totalorder %s630_s0, %s463_s13  ;;  %p467_p9 = scmp.lt.u32.totalorder %s463_s13, %s630_s0 }
  0x18   :  { %p469_p10 = pnand %p467_p9, %p464_p8 }
  0x1a   :  { %472 = shalt.err (!%p469_p10)
}
  0x1b   :  { %s473_s1 = scalar_lea.vmem %s20_s8, 128  ;;  %p478_p12 = scmp.lt.s32.totalorder %s20_s8, %s20_s8 }
  0x1c   :  { %p474_p11 = scmp.ne.s32.totalorder %s20_s8, %s473_s1  ;;  %p479_p13 = scmp.lt.s32.totalorder %s473_s1, %s473_s1 }
  0x1e   :  { %p480_p0 = por %p479_p13, %p478_p12 }
  0x20   :  { %p481_p1 = pnand %p480_p0, %p474_p11 }
  0x22   :  { %484 = shalt.err (!%p481_p1)
}
  0x23   :  { %22 = dma.hbm_to_vmem [thread:$0]  %s630_s0, 128, %s20_s8, [#allocation3]  }
  0x24   :  { %s485_s22 = scalar_lea.hbm %s633_s3, 1024 }
  0x25   :  { %p486_p2 = scmp.ne.s32.totalorder %s633_s3, %s485_s22  ;;  %p489_p3 = scmp.lt.u32.totalorder %s485_s22, %s633_s3 }
  0x27   :  { %p491_p4 = pnand %p489_p3, %p486_p2 }
  0x29   :  { %494 = shalt.err (!%p491_p4)
}
  0x2a   :  { %s495_s27 = scalar_lea.vmem %s43_s10, 1024  ;;  %p500_p6 = scmp.lt.s32.totalorder %s43_s10, %s43_s10 }
  0x2b   :  { %p496_p5 = scmp.ne.s32.totalorder %s43_s10, %s495_s27  ;;  %p501_p7 = scmp.lt.s32.totalorder %s495_s27, %s495_s27 }
  0x2d   :  { %p502_p8 = por %p501_p7, %p500_p6 }
  0x2f   :  { %p503_p9 = pnand %p502_p8, %p496_p5 }
  0x31   :  { %506 = shalt.err (!%p503_p9)
}
  0x32   :  { %s540_s0 = smov 64   ;;  %s541_s28 = smov 4  }
  0x33   :  { %48 = dma.hbm_to_vmem [thread:$0]  %s633_s3, 1024, %s43_s10, [#allocation6], %s540_s0, %s540_s0, %s541_s28  }
  0x34   :  { %529 = dma.done.wait [#allocation3], 128  }
  0x35   :  { %530 = vsyncadd [#allocation3], 4294967168 }
  0x36   :  { %531 = dma.done.wait [#allocation6], 3072  }
  0x37   :  { %532 = vsyncadd [#allocation6], 4294964224  ;;  %v542_v0 = vmov 0   ;;  %v543_v1 = vmov 0.0   ;;  %v409_v2 = vld [vmem:[#allocation5 + $0x4] ss:$8 sps:$4 sm:$0xff]   ;;  %v81_v28 = vlaneseq }
  0x38   :  { %203 = vmatprep.mubr.bf16.mxu0 %v542_v0  ;;  %378 = vmatprep.subr.bf16.mxu1 %v543_v1  ;;  %v411_v3 = vld [vmem:[#allocation5] ss:$8 sps:$4 sm:$0xff]   ;;  %v412_v4 = vld [vmem:[#allocation5 + $0x14] ss:$8 sps:$4 sm:$0xff]   ;;  %v414_v5 = vld [vmem:[#allocation5 + $0x10] ss:$8 sps:$4 sm:$0xff]  }
  0x39   :  { %171 = vmatprep.subr.bf16.mxu0 %v409_v2  ;;  %v415_v6 = vld [vmem:[#allocation5 + $0x24] ss:$8 sps:$4 sm:$0xff]   ;;  %v417_v7 = vld [vmem:[#allocation5 + $0x20] ss:$8 sps:$4 sm:$0xff]   ;;  %v418_v8 = vld [vmem:[#allocation5 + $0x34] ss:$8 sps:$4 sm:$0xff]  }
  0x3a   :  { %172 = vmatpush1.bf16.msra.mxu0 %v411_v3  ;;  %v420_v9 = vld [vmem:[#allocation5 + $0x30] ss:$8 sps:$4 sm:$0xff]   ;;  %v433_v10 = vld [vmem:[#allocation7] sm:$0xff]   ;;  %v434_v12 = vld [vmem:[#allocation7 + $0x8] sm:$0xff]   ;;  %vm544_vm0 = vmmov 0   ;;  %v82_v29 = vshrl.u32 %v81_v28, 7 }
  0x3b   :  { %173 = vmatprep.subr.bf16.mxu0 %v412_v4  ;;  %v421_v11 = vld [vmem:[#allocation5 + $0x44] ss:$8 sps:$4 sm:$0xff]   ;;  %379 = vmatpush3.bf16.msra.mxu1 %v433_v10  ;;  %v423_v13 = vld [vmem:[#allocation5 + $0x40] ss:$8 sps:$4 sm:$0xff]   ;;  %v424_v14 = vld [vmem:[#allocation5 + $0x54] ss:$8 sps:$4 sm:$0xff]  }
  0x3c   :  { %380 = vmatprep.subr.bf16.mxu1 %v543_v1  ;;  %v435_v15 = vld [vmem:[#allocation7 + $0x10] sm:$0xff]   ;;  %v427_v17 = vld [vmem:[#allocation5 + $0x64] ss:$8 sps:$4 sm:$0xff]   ;;  %v436_v18 = vld [vmem:[#allocation7 + $0x18] sm:$0xff]   ;;  %394 = vmatprep.mubr.msk.bf16.mxu1 %vm544_vm0, %v543_v1  ;;  %v83_v30 = vsub.s32 0, %v82_v29  ;;  %v87_v40 = vsub.s32 1, %v82_v29 }
  0x3d   :  { %v426_v16 = vld [vmem:[#allocation5 + $0x50] ss:$8 sps:$4 sm:$0xff]   ;;  %v429_v19 = vld [vmem:[#allocation5 + $0x60] ss:$8 sps:$4 sm:$0xff]   ;;  %v430_v20 = vld [vmem:[#allocation5 + $0x74] ss:$8 sps:$4 sm:$0xff]  }
  0x3e   :  { %174 = vmatpush1.bf16.msra.mxu0 %v414_v5  ;;  %v437_v21 = vld [vmem:[#allocation7 + $0x20] sm:$0xff]   ;;  %v432_v22 = vld [vmem:[#allocation5 + $0x70] ss:$8 sps:$4 sm:$0xff]   ;;  %v438_v24 = vld [vmem:[#allocation7 + $0x28] sm:$0xff]  }
  0x3f   :  { %175 = vmatprep.subr.bf16.mxu0 %v415_v6  ;;  %381 = vmatpush3.bf16.msra.mxu1 %v434_v12  ;;  %v61_v23 = vld [vmem:[#allocation2] sm:$0xff]  ;;  %v439_v26 = vld [vmem:[#allocation7 + $0x30] sm:$0xff]  }
  0x40   :  { %382 = vmatprep.subr.bf16.mxu1 %v543_v1  ;;  %v62_v25 = vpack.c.bf16 %v61_v23, %v61_v23  ;;  %v440_v27 = vld [vmem:[#allocation7 + $0x38] sm:$0xff]  }
  0x41   :  { %v79_v31 = vld [vmem:[%s632_s2] sm:$0x3]  ;;  %s545_s2 = smov [#allocation8]  }
  0x42   :  { %176 = vmatpush1.bf16.msra.mxu0 %v417_v7  ;;  %v84_v32 = vrot.slane %v79_v31, %v83_v30  ;;  %v88_v41 = vrot.slane %v79_v31, %v87_v40  ;;  %v360_v42 = vld [vmem:[%s634_s4] ss:$0 sm:$0xff]  ;;  %s334_s9 = sshll.u32 %s545_s2, 4  ;;  %s335_s9 = int_to_ptr.vmem [resolvable:$true] %s334_s9 }
  0x43   :  { %177 = vmatprep.subr.bf16.mxu0 %v418_v8  ;;  %383 = vmatpush3.bf16.msra.mxu1 %v435_v15  ;;  %s507_s10 = scalar_lea.vmem %s335_s9, 128  ;;  %p512_p11 = scmp.lt.s32.totalorder %s335_s9, %s335_s9 }
  0x44   :  { %384 = vmatprep.subr.bf16.mxu1 %v543_v1  ;;  %p508_p10 = scmp.ne.s32.totalorder %s335_s9, %s507_s10  ;;  %p513_p12 = scmp.lt.s32.totalorder %s507_s10, %s507_s10 }
  0x46   :  { %178 = vmatpush1.bf16.msra.mxu0 %v420_v9  ;;  %p514_p13 = por %p513_p12, %p512_p11 }
  0x47   :  { %179 = vmatprep.subr.bf16.mxu0 %v421_v11  ;;  %385 = vmatpush3.bf16.msra.mxu1 %v436_v18 }
  0x48   :  { %386 = vmatprep.subr.bf16.mxu1 %v543_v1  ;;  %p515_p0 = pnand %p514_p13, %p508_p10 }
  0x4a   :  { %180 = vmatpush1.bf16.msra.mxu0 %v423_v13 }
  0x4b   :  { %181 = vmatprep.subr.bf16.mxu0 %v424_v14  ;;  %387 = vmatpush3.bf16.msra.mxu1 %v437_v21 }
  0x4c   :  { %388 = vmatprep.subr.bf16.mxu1 %v543_v1 }
  0x4e   :  { %182 = vmatpush1.bf16.msra.mxu0 %v426_v16 }
  0x4f   :  { %183 = vmatprep.subr.bf16.mxu0 %v427_v17  ;;  %389 = vmatpush3.bf16.msra.mxu1 %v438_v24 }
  0x50   :  { %390 = vmatprep.subr.bf16.mxu1 %v543_v1 }
  0x52   :  { %184 = vmatpush1.bf16.msra.mxu0 %v429_v19 }
  0x53   :  { %185 = vmatprep.subr.bf16.mxu0 %v430_v20  ;;  %391 = vmatpush3.bf16.msra.mxu1 %v439_v26 }
  0x54   :  { %392 = vmatprep.subr.bf16.mxu1 %v543_v1 }
  0x56   :  { %186 = vmatpush1.bf16.msra.mxu0 %v432_v22 }
  0x57   :  { %393 = vmatpush3.bf16.msra.mxu1 %v440_v27 }
  0x59   :  { %204 = vmatmul.mubr.bf16.vlgmr.msra.gmra.mrb[0].mxu0 %v62_v25 }
 0x12c   :  { %v205_v33 = vpop.f32.mrb[0].mxu0 }
 0x12d   :  { %v206_v34 = vadd.f32 %v205_v33, %v84_v32  ;;  %v207_v35 = vpop.f32.mrb[1].mxu0 }
 0x12e   :  { %v209_v36 = vpop.f32.mrb[2].mxu0  ;;  %v208_v44 = vadd.f32 %v207_v35, %v88_v41 }
 0x12f   :  { %v212_v37 = vmax.f32 %v206_v34, 0.0  ;;  %v210_v38 = vpop.f32.mrb[3].mxu0 }
 0x131   :  { %v213_v39 = vpack.c.bf16 %v212_v37, %v212_v37 }
 0x133   :  { %395 = vmatmul.mubr.bf16.vlgmr.msra.gmra.mrb[0].mxu1 %v213_v39 }
 0x206   :  { %v319_v43 = vpop.f32.mrb[0].mxu1 }
 0x207   :  { %v320_v45 = vadd.f32 %v360_v42, %v319_v43  ;;  %v396_v46 = vpop.f32.mrb[1].mxu1 }
 0x208   :  { %v322_v47 = vpop.f32.mrb[2].mxu1 }
 0x209   :  { %v325_v48 = vadd.f32 %v320_v45, %v208_v44  ;;  %v397_v49 = vpop.f32.mrb[3].mxu1 }
 0x20b   :  { %v326_v50 = vmax.f32 %v325_v48, 0.0 }
 0x20d   :  { %327 = vst [vmem:[#allocation8] sm:$0xff] %v326_v50 }
 0x20e   :  { %518 = shalt.err (!%p515_p0)
}
 0x20f   :  { %s519_s12 = scalar_lea.hbm %s635_s5, 128 }
 0x210   :  { %p520_p1 = scmp.ne.s32.totalorder %s635_s5, %s519_s12  ;;  %p523_p2 = scmp.lt.u32.totalorder %s519_s12, %s635_s5 }
 0x212   :  { %p525_p3 = pnand %p523_p2, %p520_p1 }
 0x214   :  { %528 = shalt.err (!%p525_p3)
}
 0x215   :  { %337 = dma.vmem_to_hbm [thread:$0]  %s335_s9, 128, %s635_s5, [#allocation4]  }
 0x216   :  { %533 = dma.done.wait [#allocation4], 128  }
 0x217   :  { %534 = vsyncadd [#allocation4], 4294967168 }
 0x218   :  { %341 = vsyncpa [#allocation3], 1 }
 0x219   :  { %342 = vsyncpa [#allocation6], 1 }
 0x21a   :  { %343 = vsyncpa [#allocation4], 1 }

// kernel: tpu_custom_call.1
= control target key start
LH: loop header
LB: loop body
LE: loop exit
PB: predicated region body
PF: predicated region fallthrough
CT: control target
= control target key end

     0   :  { %10 = vsyncpa [#allocation3], 0  ;;  %s630_s0 = inlined_call_operand.hbm [shape: f32[8,128], index: 0, kind: input, shape index: {}]   ;;  %s631_s1 = inlined_call_operand.hbm [shape: bf16[128,256], index: 1, kind: input, shape index: {}]   ;;  %s632_s2 = inlined_call_operand.vmem [shape: f32[1,256], index: 2, kind: input, shape index: {}]   ;;  %s633_s3 = inlined_call_operand.hbm [shape: bf16[128,128], index: 3, kind: input, shape index: {}]   ;;  %s634_s4 = inlined_call_operand.vmem [shape: f32[1,128], index: 4, kind: input, shape index: {}]   ;;  %s635_s5 = inlined_call_operand.hbm [shape: f32[8,128], index: 5, kind: output, shape index: {}]  }
   0x1   :  { %11 = vsyncpa [#allocation6], 0 }
   0x2   :  { %12 = vsyncpa [#allocation4], 0  ;;  %s535_s18 = smov [#allocation5]   ;;  %s441_s22 = scalar_lea.hbm %s631_s1, 2048 }
   0x3   :  { %s28_s19 = sshll.u32 %s535_s18, 4  ;;  %p442_p0 = scmp.ne.s32.totalorder %s631_s1, %s441_s22  ;;  %s29_s19 = int_to_ptr.vmem [resolvable:$true] %s28_s19 }
   0x4   :  { %p445_p1 = scmp.lt.u32.totalorder %s441_s22, %s631_s1 }
   0x6   :  { %p447_p2 = pnand %p445_p1, %p442_p0 }
   0x8   :  { %450 = shalt.err (!%p447_p2)
}
   0x9   :  { %s451_s27 = scalar_lea.vmem %s29_s19, 2048  ;;  %p456_p4 = scmp.lt.s32.totalorder %s29_s19, %s29_s19 }
   0xa   :  { %p452_p3 = scmp.ne.s32.totalorder %s29_s19, %s451_s27  ;;  %p457_p5 = scmp.lt.s32.totalorder %s451_s27, %s451_s27 }
   0xc   :  { %p458_p6 = por %p457_p5, %p456_p4 }
   0xe   :  { %p459_p7 = pnand %p458_p6, %p452_p3 }
  0x10   :  { %462 = shalt.err (!%p459_p7)
}
  0x11   :  { %s536_s28 = smov 128   ;;  %s537_s29 = smov 8  }
  0x12   :  { %34 = dma.hbm_to_vmem [thread:$0]  %s631_s1, 2048, %s29_s19, [#allocation6], %s536_s28, %s536_s28, %s537_s29  }
  0x13   :  { %s538_s7 = smov [#allocation2]   ;;  %s539_s9 = smov [#allocation7]  }
  0x14   :  { %s19_s8 = sshll.u32 %s538_s7, 4  ;;  %s42_s10 = sshll.u32 %s539_s9, 4  ;;  %s20_s8 = int_to_ptr.vmem [resolvable:$true] %s19_s8  ;;  %s43_s10 = int_to_ptr.vmem [resolvable:$true] %s42_s10 }
  0x15   :  { %s463_s13 = scalar_lea.hbm %s630_s0, 128 }
  0x16   :  { %p464_p8 = scmp.ne.s32.totalorder %s630_s0, %s463_s13  ;;  %p467_p9 = scmp.lt.u32.totalorder %s463_s13, %s630_s0 }
  0x18   :  { %p469_p10 = pnand %p467_p9, %p464_p8 }
  0x1a   :  { %472 = shalt.err (!%p469_p10)
}
  0x1b   :  { %s473_s1 = scalar_lea.vmem %s20_s8, 128  ;;  %p478_p12 = scmp.lt.s32.totalorder %s20_s8, %s20_s8 }
  0x1c   :  { %p474_p11 = scmp.ne.s32.totalorder %s20_s8, %s473_s1  ;;  %p479_p13 = scmp.lt.s32.totalorder %s473_s1, %s473_s1 }
  0x1e   :  { %p480_p0 = por %p479_p13, %p478_p12 }
  0x20   :  { %p481_p1 = pnand %p480_p0, %p474_p11 }
  0x22   :  { %484 = shalt.err (!%p481_p1)
}
  0x23   :  { %22 = dma.hbm_to_vmem [thread:$0]  %s630_s0, 128, %s20_s8, [#allocation3]  }
  0x24   :  { %s485_s22 = scalar_lea.hbm %s633_s3, 1024 }
  0x25   :  { %p486_p2 = scmp.ne.s32.totalorder %s633_s3, %s485_s22  ;;  %p489_p3 = scmp.lt.u32.totalorder %s485_s22, %s633_s3 }
  0x27   :  { %p491_p4 = pnand %p489_p3, %p486_p2 }
  0x29   :  { %494 = shalt.err (!%p491_p4)
}
  0x2a   :  { %s495_s27 = scalar_lea.vmem %s43_s10, 1024  ;;  %p500_p6 = scmp.lt.s32.totalorder %s43_s10, %s43_s10 }
  0x2b   :  { %p496_p5 = scmp.ne.s32.totalorder %s43_s10, %s495_s27  ;;  %p501_p7 = scmp.lt.s32.totalorder %s495_s27, %s495_s27 }
  0x2d   :  { %p502_p8 = por %p501_p7, %p500_p6 }
  0x2f   :  { %p503_p9 = pnand %p502_p8, %p496_p5 }
  0x31   :  { %506 = shalt.err (!%p503_p9)
}
  0x32   :  { %s540_s0 = smov 64   ;;  %s541_s28 = smov 4  }
  0x33   :  { %48 = dma.hbm_to_vmem [thread:$0]  %s633_s3, 1024, %s43_s10, [#allocation6], %s540_s0, %s540_s0, %s541_s28  }
  0x34   :  { %529 = dma.done.wait [#allocation3], 128  }
  0x35   :  { %530 = vsyncadd [#allocation3], 4294967168 }
  0x36   :  { %531 = dma.done.wait [#allocation6], 3072  }
  0x37   :  { %532 = vsyncadd [#allocation6], 4294964224  ;;  %v542_v0 = vmov 0   ;;  %v543_v1 = vmov 0.0   ;;  %v409_v2 = vld [vmem:[#allocation5 + $0x4] ss:$8 sps:$4 sm:$0xff]   ;;  %v81_v28 = vlaneseq }
  0x38   :  { %203 = vmatprep.mubr.bf16.mxu0 %v542_v0  ;;  %378 = vmatprep.subr.bf16.mxu1 %v543_v1  ;;  %v411_v3 = vld [vmem:[#allocation5] ss:$8 sps:$4 sm:$0xff]   ;;  %v412_v4 = vld [vmem:[#allocation5 + $0x14] ss:$8 sps:$4 sm:$0xff]   ;;  %v414_v5 = vld [vmem:[#allocation5 + $0x10] ss:$8 sps:$4 sm:$0xff]  }
  0x39   :  { %171 = vmatprep.subr.bf16.mxu0 %v409_v2  ;;  %v415_v6 = vld [vmem:[#allocation5 + $0x24] ss:$8 sps:$4 sm:$0xff]   ;;  %v417_v7 = vld [vmem:[#allocation5 + $0x20] ss:$8 sps:$4 sm:$0xff]   ;;  %v418_v8 = vld [vmem:[#allocation5 + $0x34] ss:$8 sps:$4 sm:$0xff]  }
  0x3a   :  { %172 = vmatpush1.bf16.msra.mxu0 %v411_v3  ;;  %v420_v9 = vld [vmem:[#allocation5 + $0x30] ss:$8 sps:$4 sm:$0xff]   ;;  %v433_v10 = vld [vmem:[#allocation7] sm:$0xff]   ;;  %v434_v12 = vld [vmem:[#allocation7 + $0x8] sm:$0xff]   ;;  %vm544_vm0 = vmmov 0   ;;  %v82_v29 = vshrl.u32 %v81_v28, 7 }
  0x3b   :  { %173 = vmatprep.subr.bf16.mxu0 %v412_v4  ;;  %v421_v11 = vld [vmem:[#allocation5 + $0x44] ss:$8 sps:$4 sm:$0xff]   ;;  %379 = vmatpush3.bf16.msra.mxu1 %v433_v10  ;;  %v423_v13 = vld [vmem:[#allocation5 + $0x40] ss:$8 sps:$4 sm:$0xff]   ;;  %v424_v14 = vld [vmem:[#allocation5 + $0x54] ss:$8 sps:$4 sm:$0xff]  }
  0x3c   :  { %380 = vmatprep.subr.bf16.mxu1 %v543_v1  ;;  %v435_v15 = vld [vmem:[#allocation7 + $0x10] sm:$0xff]   ;;  %v427_v17 = vld [vmem:[#allocation5 + $0x64] ss:$8 sps:$4 sm:$0xff]   ;;  %v436_v18 = vld [vmem:[#allocation7 + $0x18] sm:$0xff]   ;;  %394 = vmatprep.mubr.msk.bf16.mxu1 %vm544_vm0, %v543_v1  ;;  %v83_v30 = vsub.s32 0, %v82_v29  ;;  %v87_v40 = vsub.s32 1, %v82_v29 }
  0x3d   :  { %v426_v16 = vld [vmem:[#allocation5 + $0x50] ss:$8 sps:$4 sm:$0xff]   ;;  %v429_v19 = vld [vmem:[#allocation5 + $0x60] ss:$8 sps:$4 sm:$0xff]   ;;  %v430_v20 = vld [vmem:[#allocation5 + $0x74] ss:$8 sps:$4 sm:$0xff]  }
  0x3e   :  { %174 = vmatpush1.bf16.msra.mxu0 %v414_v5  ;;  %v437_v21 = vld [vmem:[#allocation7 + $0x20] sm:$0xff]   ;;  %v432_v22 = vld [vmem:[#allocation5 + $0x70] ss:$8 sps:$4 sm:$0xff]   ;;  %v438_v24 = vld [vmem:[#allocation7 + $0x28] sm:$0xff]  }
  0x3f   :  { %175 = vmatprep.subr.bf16.mxu0 %v415_v6  ;;  %381 = vmatpush3.bf16.msra.mxu1 %v434_v12  ;;  %v61_v23 = vld [vmem:[#allocation2] sm:$0xff]  ;;  %v439_v26 = vld [vmem:[#allocation7 + $0x30] sm:$0xff]  }
  0x40   :  { %382 = vmatprep.subr.bf16.mxu1 %v543_v1  ;;  %v62_v25 = vpack.c.bf16 %v61_v23, %v61_v23  ;;  %v440_v27 = vld [vmem:[#allocation7 + $0x38] sm:$0xff]  }
  0x41   :  { %v79_v31 = vld [vmem:[%s632_s2] sm:$0x3]  ;;  %s545_s2 = smov [#allocation8]  }
  0x42   :  { %176 = vmatpush1.bf16.msra.mxu0 %v417_v7  ;;  %v84_v32 = vrot.slane %v79_v31, %v83_v30  ;;  %v88_v41 = vrot.slane %v79_v31, %v87_v40  ;;  %v360_v42 = vld [vmem:[%s634_s4] ss:$0 sm:$0xff]  ;;  %s334_s9 = sshll.u32 %s545_s2, 4  ;;  %s335_s9 = int_to_ptr.vmem [resolvable:$true] %s334_s9 }
  0x43   :  { %177 = vmatprep.subr.bf16.mxu0 %v418_v8  ;;  %383 = vmatpush3.bf16.msra.mxu1 %v435_v15  ;;  %s507_s10 = scalar_lea.vmem %s335_s9, 128  ;;  %p512_p11 = scmp.lt.s32.totalorder %s335_s9, %s335_s9 }
  0x44   :  { %384 = vmatprep.subr.bf16.mxu1 %v543_v1  ;;  %p508_p10 = scmp.ne.s32.totalorder %s335_s9, %s507_s10  ;;  %p513_p12 = scmp.lt.s32.totalorder %s507_s10, %s507_s10 }
  0x46   :  { %178 = vmatpush1.bf16.msra.mxu0 %v420_v9  ;;  %p514_p13 = por %p513_p12, %p512_p11 }
  0x47   :  { %179 = vmatprep.subr.bf16.mxu0 %v421_v11  ;;  %385 = vmatpush3.bf16.msra.mxu1 %v436_v18 }
  0x48   :  { %386 = vmatprep.subr.bf16.mxu1 %v543_v1  ;;  %p515_p0 = pnand %p514_p13, %p508_p10 }
  0x4a   :  { %180 = vmatpush1.bf16.msra.mxu0 %v423_v13 }
  0x4b   :  { %181 = vmatprep.subr.bf16.mxu0 %v424_v14  ;;  %387 = vmatpush3.bf16.msra.mxu1 %v437_v21 }
  0x4c   :  { %388 = vmatprep.subr.bf16.mxu1 %v543_v1 }
  0x4e   :  { %182 = vmatpush1.bf16.msra.mxu0 %v426_v16 }
  0x4f   :  { %183 = vmatprep.subr.bf16.mxu0 %v427_v17  ;;  %389 = vmatpush3.bf16.msra.mxu1 %v438_v24 }
  0x50   :  { %390 = vmatprep.subr.bf16.mxu1 %v543_v1 }
  0x52   :  { %184 = vmatpush1.bf16.msra.mxu0 %v429_v19 }
  0x53   :  { %185 = vmatprep.subr.bf16.mxu0 %v430_v20  ;;  %391 = vmatpush3.bf16.msra.mxu1 %v439_v26 }
  0x54   :  { %392 = vmatprep.subr.bf16.mxu1 %v543_v1 }
  0x56   :  { %186 = vmatpush1.bf16.msra.mxu0 %v432_v22 }
  0x57   :  { %393 = vmatpush3.bf16.msra.mxu1 %v440_v27 }
  0x59   :  { %204 = vmatmul.mubr.bf16.vlgmr.msra.gmra.mrb[0].mxu0 %v62_v25 }
 0x12c   :  { %v205_v33 = vpop.f32.mrb[0].mxu0 }
 0x12d   :  { %v206_v34 = vadd.f32 %v205_v33, %v84_v32  ;;  %v207_v35 = vpop.f32.mrb[1].mxu0 }
 0x12e   :  { %v209_v36 = vpop.f32.mrb[2].mxu0  ;;  %v208_v44 = vadd.f32 %v207_v35, %v88_v41 }
 0x12f   :  { %v212_v37 = vmax.f32 %v206_v34, 0.0  ;;  %v210_v38 = vpop.f32.mrb[3].mxu0 }
 0x131   :  { %v213_v39 = vpack.c.bf16 %v212_v37, %v212_v37 }
 0x133   :  { %395 = vmatmul.mubr.bf16.vlgmr.msra.gmra.mrb[0].mxu1 %v213_v39 }
 0x206   :  { %v319_v43 = vpop.f32.mrb[0].mxu1 }
 0x207   :  { %v320_v45 = vadd.f32 %v360_v42, %v319_v43  ;;  %v396_v46 = vpop.f32.mrb[1].mxu1 }
 0x208   :  { %v322_v47 = vpop.f32.mrb[2].mxu1 }
 0x209   :  { %v325_v48 = vadd.f32 %v320_v45, %v208_v44  ;;  %v397_v49 = vpop.f32.mrb[3].mxu1 }
 0x20b   :  { %v326_v50 = vmax.f32 %v325_v48, 0.0 }
 0x20d   :  { %327 = vst [vmem:[#allocation8] sm:$0xff] %v326_v50 }
 0x20e   :  { %518 = shalt.err (!%p515_p0)
}
 0x20f   :  { %s519_s12 = scalar_lea.hbm %s635_s5, 128 }
 0x210   :  { %p520_p1 = scmp.ne.s32.totalorder %s635_s5, %s519_s12  ;;  %p523_p2 = scmp.lt.u32.totalorder %s519_s12, %s635_s5 }
 0x212   :  { %p525_p3 = pnand %p523_p2, %p520_p1 }
 0x214   :  { %528 = shalt.err (!%p525_p3)
}
 0x215   :  { %337 = dma.vmem_to_hbm [thread:$0]  %s335_s9, 128, %s635_s5, [#allocation4]  }
 0x216   :  { %533 = dma.done.wait [#allocation4], 128  }
 0x217   :  { %534 = vsyncadd [#allocation4], 4294967168 }
 0x218   :  { %341 = vsyncpa [#allocation3], 1 }
 0x219   :  { %342 = vsyncpa [#allocation6], 1 }
 0x21a   :  { %343 = vsyncpa [#allocation4], 1 }

</bundles_post_ra>
